<compile_context>
chip_gen: v7x
topology: tpu7x:2x2x1
jax: 0.10.0
libtpu: 0.0.40
codegen_flags: <defaults>
</compile_context>

<pallas_src>
import functools
import math

import jax
import jax.numpy as jnp
import numpy as np
from jax.experimental import pallas as pl
from jax.experimental.pallas import tpu as pltpu

_TILE_BYTES = 2 * 1024 * 1024  # target output block size (see header comment)


def _location_encoder_kernel(*refs, two_g: int, static_scale: float,
                             has_dynamic_scale: bool):
    """One grid step: (TR, 2G) packed coords -> (TR, W=G*embed_dim) embeddings."""
    if has_dynamic_scale:
        coords_ref, tab_ref, scale_ref, out_ref = refs
    else:
        coords_ref, tab_ref, out_ref = refs

    # phase[r, l] = pos(r, l) * omega(l).
    # tab rows 0..2G-1 are zero-masked omega rows: each lane has exactly one
    # non-zero contribution, so this sum of broadcast multiplies reproduces the
    # reference outer product bit-exactly while running full 128-lane wide.
    phase = coords_ref[:, 0:1] * tab_ref[0:1, :]
    for k in range(1, two_g):
        phase = phase + coords_ref[:, k:k + 1] * tab_ref[k:k + 1, :]

    # Two full-width transcendental streams + one lane select.
    # (Deliberately NOT cos(x) = sin(x + pi/2): lon*omega reaches ~180 rad.)
    sin_part = jnp.sin(phase)
    cos_part = jnp.cos(phase)
    cos_lane = tab_ref[two_g:two_g + 1, :] > 0.5      # (1, W) mask row
    emb = jnp.where(cos_lane, cos_part, sin_part)

    if has_dynamic_scale:
        emb = emb * scale_ref[0, 0]
    elif static_scale != 1.0:
        emb = emb * static_scale

    out_ref[...] = emb                                # full-lane, unmasked store


def _build_table(embed_dim: int, G: int) -> jnp.ndarray:
    """(2G+1, G*embed_dim) table: zero-masked omega rows + cos-lane mask row."""
    lat_d = embed_dim // 2
    lon_d = embed_dim - lat_d
    half_lat, half_lon = lat_d // 2, lon_d // 2

    # omega with the exact same f32 expression as the reference / PyTorch code.
    om_lat = 1.0 / (10000.0 ** (jnp.arange(half_lat, dtype=jnp.float32)
                                / (lat_d / 2.0)))
    om_lon = 1.0 / (10000.0 ** (jnp.arange(half_lon, dtype=jnp.float32)
                                / (lon_d / 2.0)))
    # Per-position omega for one embedding: [sin_lat, cos_lat, sin_lon, cos_lon].
    omega_row = jnp.concatenate([om_lat, om_lat, om_lon, om_lon])    # (D,)
    omega_full = jnp.tile(omega_row, (G,))                           # (W,)

    # Integer lane descriptors (exact, host-side numpy).
    p = np.tile(np.arange(embed_dim), G)                             # (W,)
    g = np.repeat(np.arange(G), embed_dim)                           # (W,)
    is_lon = p >= lat_d
    p_seg = np.where(is_lon, p - lat_d, p)
    half = np.where(is_lon, half_lon, half_lat)
    is_cos = p_seg >= half
    owner = 2 * g + is_lon.astype(np.int64)      # packed-coord column feeding lane l

    sel = (np.arange(2 * G)[:, None] == owner[None, :]).astype(np.float32)
    omega_rows = jnp.asarray(sel) * omega_full[None, :]              # (2G, W)
    mask_row = jnp.asarray(is_cos.astype(np.float32))[None, :]       # (1, W)
    return jnp.concatenate([omega_rows, mask_row], axis=0)           # (2G+1, W)


def _reference_forward(location_coords, embed_dim, scale=1.0):
    """Pure-JAX reference mirroring the PyTorch module (also the small-B path)."""
    def sincos(d, pos):
        omega = jnp.arange(d // 2, dtype=jnp.float32) / (d / 2.0)
        omega = 1.0 / (10000.0 ** omega)
        out = jnp.einsum('m,d->md', pos.reshape(-1), omega)
        return jnp.concatenate([jnp.sin(out), jnp.cos(out)], axis=1)

    B = location_coords.shape[0]
    lat_d = embed_dim // 2
    lon_d = embed_dim - lat_d
    lat = sincos(lat_d, location_coords[:, 0]).reshape(B, 1, -1)
    lon = sincos(lon_d, location_coords[:, 1]).reshape(B, 1, -1)
    return scale * jnp.concatenate([lat, lon], axis=-1)


def location_encoder_forward(location_coords: jnp.ndarray,
                             embed_dim: int,
                             scale=1.0,
                             block_rows: int | None = None,
                             force_pallas: bool = False) -> jnp.ndarray:
    """location_coords: (B, 2) [lat, lon] -> (B, 1, embed_dim) float32."""
    B = location_coords.shape[0]
    lat_d = embed_dim // 2
    lon_d = embed_dim - lat_d
    assert lat_d % 2 == 0 and lon_d % 2 == 0, "embed_dim must be a multiple of 4"

    coords = location_coords.astype(jnp.float32)
    dynamic_scale = not isinstance(scale, (int, float))

    # Pack G batch rows per output row so the output last dim is lane-dense:
    # G * embed_dim = lcm(embed_dim, 128).
    G = 128 // math.gcd(embed_dim, 128)
    W = G * embed_dim

    # Realistic small-B use is launch-latency bound -> pure-JAX fast path.
    # (Also used for degenerate tiny embed_dims that would need G > 8.)
    if (B * embed_dim < 65536 and not force_pallas) or G > 8:
        # TODO(synk): fuse this sincos embedding into the consuming pallas_call.
        return _reference_forward(coords, embed_dim, scale)

    rows = pl.cdiv(B, G)
    if block_rows is None:
        # ~2 MiB output block, but keep >= 2 grid steps on sizeable inputs so
        # the "parallel" B axis is split across both TensorCores on v7x.
        target = max(8, ((_TILE_BYTES // (W * 4)) // 8) * 8)
        two_way = ((pl.cdiv(rows, 2) + 7) // 8) * 8
        block_rows = max(8, min(target, two_way))
    else:
        block_rows = max(8, ((block_rows + 7) // 8) * 8)

    padded_rows = pl.cdiv(rows, block_rows) * block_rows
    padded_b = padded_rows * G
    if padded_b != B:
        coords = jnp.pad(coords, ((0, padded_b - B), (0, 0)))
    # Free contiguous reshape: row r holds [lat_{rG}, lon_{rG}, lat_{rG+1}, ...]
    coords_packed = coords.reshape(padded_rows, 2 * G)

    table = _build_table(embed_dim, G)          # (2G+1, W), grid-invariant

    kernel = functools.partial(
        _location_encoder_kernel,
        two_g=2 * G,
        static_scale=1.0 if dynamic_scale else float(scale),
        has_dynamic_scale=dynamic_scale)

    in_specs = [
        pl.BlockSpec((block_rows, 2 * G), lambda i: (i, 0)),   # packed coords
        pl.BlockSpec((2 * G + 1, W), lambda i: (0, 0)),        # omega/mask table
    ]
    args = [coords_packed, table]
    if dynamic_scale:
        in_specs.append(pl.BlockSpec(memory_space=pltpu.MemorySpace.SMEM))
        args.append(jnp.asarray(scale, jnp.float32).reshape(1, 1))

    out = pl.pallas_call(
        kernel,
        out_shape=jax.ShapeDtypeStruct((padded_rows, W), jnp.float32),
        grid=(padded_rows // block_rows,),
        in_specs=in_specs,
        out_specs=pl.BlockSpec((block_rows, W), lambda i: (i, 0)),
        compiler_params=pltpu.CompilerParams(
            dimension_semantics=("parallel",),
            vmem_limit_bytes=32 * 1024 * 1024),
    )(*args)

    out = out.reshape(padded_b, embed_dim)
    if padded_b != B:
        out = out[:B]
    return out.reshape(B, 1, embed_dim)


if __name__ == "__main__":
    key = jax.random.PRNGKey(0)
    embed_dim = 32                        # lat_embed_dim = lon_embed_dim = 16

    # 1) Module-typical tiny batch, forced through the Pallas kernel.
    coords1 = jax.random.uniform(key, (2, 2), dtype=jnp.float32,
                                 minval=-90.0, maxval=90.0)
    out1 = jax.block_until_ready(
        location_encoder_forward(coords1, embed_dim, scale=1.0,
                                 force_pallas=True))
    ref1 = _reference_forward(coords1, embed_dim, 1.0)
    assert out1.shape == (2, 1, embed_dim)
    assert jnp.allclose(out1, ref1, atol=1e-5, rtol=1e-5)

    # 2) Larger batch: multi-step grid, row padding, static scale != 1.
    coords2 = jax.random.uniform(jax.random.PRNGKey(1), (1000, 2),
                                 dtype=jnp.float32, minval=-180.0, maxval=180.0)
    out2 = jax.block_until_ready(
        location_encoder_forward(coords2, embed_dim, scale=0.1,
                                 block_rows=64, force_pallas=True))
    ref2 = _reference_forward(coords2, embed_dim, 0.1)
    assert out2.shape == (1000, 1, embed_dim)
    assert jnp.allclose(out2, ref2, atol=1e-5, rtol=1e-5)

    # 3) Trainable (traced) scale via the SMEM-scalar path.
    coords3 = jax.random.uniform(jax.random.PRNGKey(2), (40, 2),
                                 dtype=jnp.float32, minval=-180.0, maxval=180.0)
    scale3 = jnp.full((1,), 0.1, dtype=jnp.float32)
    out3 = jax.block_until_ready(
        location_encoder_forward(coords3, embed_dim, scale=scale3,
                                 force_pallas=True))
    ref3 = _reference_forward(coords3, embed_dim, scale3)
    assert out3.shape == (40, 1, embed_dim)
    assert jnp.allclose(out3, ref3, atol=1e-5, rtol=1e-5)

    # 4) embed_dim already a multiple of 128 (G == 1 path).
    coords4 = jax.random.uniform(jax.random.PRNGKey(3), (64, 2),
                                 dtype=jnp.float32, minval=-90.0, maxval=90.0)
    out4 = jax.block_until_ready(
        location_encoder_forward(coords4, 128, scale=1.0, force_pallas=True))
    ref4 = _reference_forward(coords4, 128, 1.0)
    assert out4.shape == (64, 1, 128)
    assert jnp.allclose(out4, ref4, atol=1e-5, rtol=1e-5)

    # 5) Default small-B dispatch (pure-JAX fast path).
    out5 = jax.block_until_ready(
        location_encoder_forward(coords1, embed_dim, scale=1.0))
    assert jnp.allclose(out5, ref1, atol=1e-5, rtol=1e-5)

    print("KERNEL_OK")
</pallas_src>

<mosaic_0001>
module attributes {stable_mosaic.version = 11 : i64} {
  func.func @_location_encoder_kernel(%arg0: i32, %arg1: memref<8x8xf32, #tpu.memory_space<vmem>>, %arg2: memref<9x128xf32, #tpu.memory_space<vmem>>, %arg3: memref<8x128xf32, #tpu.memory_space<vmem>>) attributes {dimension_semantics = [#tpu.dimension_semantics<parallel>], iteration_bounds = array<i64: 1>, scalar_prefetch = 0 : i64, scratch_operands = 0 : i64, tpu.core_type = #tpu.core_type<tc>, window_params = [{transform_indices = @transform_0, window_bounds = array<i64: 8, 8>}, {pipeline_mode = #tpu.pipeline_mode<synchronous>, transform_indices = @transform_1, window_bounds = array<i64: 9, 128>}, {transform_indices = @transform_2, window_bounds = array<i64: 8, 128>}]} {
    %c0 = arith.constant 0 : index
    %c0_0 = arith.constant 0 : index
    %0 = vector.load %arg1[%c0, %c0_0] : memref<8x8xf32, #tpu.memory_space<vmem>>, vector<8x1xf32>
    %c0_1 = arith.constant 0 : index
    %c0_2 = arith.constant 0 : index
    %1 = vector.load %arg2[%c0_1, %c0_2] : memref<9x128xf32, #tpu.memory_space<vmem>>, vector<1x128xf32>
    %2 = vector.broadcast %0 : vector<8x1xf32> to vector<8x128xf32>
    %3 = vector.broadcast %1 : vector<1x128xf32> to vector<8x128xf32>
    %4 = arith.mulf %2, %3 : vector<8x128xf32>
    %c0_3 = arith.constant 0 : index
    %c1 = arith.constant 1 : index
    %5 = vector.load %arg1[%c0_3, %c1] : memref<8x8xf32, #tpu.memory_space<vmem>>, vector<8x1xf32>
    %c1_4 = arith.constant 1 : index
    %c0_5 = arith.constant 0 : index
    %6 = vector.load %arg2[%c1_4, %c0_5] : memref<9x128xf32, #tpu.memory_space<vmem>>, vector<1x128xf32>
    %7 = vector.broadcast %5 : vector<8x1xf32> to vector<8x128xf32>
    %8 = vector.broadcast %6 : vector<1x128xf32> to vector<8x128xf32>
    %9 = arith.mulf %7, %8 : vector<8x128xf32>
    %10 = arith.addf %4, %9 : vector<8x128xf32>
    %c0_6 = arith.constant 0 : index
    %c2 = arith.constant 2 : index
    %11 = vector.load %arg1[%c0_6, %c2] : memref<8x8xf32, #tpu.memory_space<vmem>>, vector<8x1xf32>
    %c2_7 = arith.constant 2 : index
    %c0_8 = arith.constant 0 : index
    %12 = vector.load %arg2[%c2_7, %c0_8] : memref<9x128xf32, #tpu.memory_space<vmem>>, vector<1x128xf32>
    %13 = vector.broadcast %11 : vector<8x1xf32> to vector<8x128xf32>
    %14 = vector.broadcast %12 : vector<1x128xf32> to vector<8x128xf32>
    %15 = arith.mulf %13, %14 : vector<8x128xf32>
    %16 = arith.addf %10, %15 : vector<8x128xf32>
    %c0_9 = arith.constant 0 : index
    %c3 = arith.constant 3 : index
    %17 = vector.load %arg1[%c0_9, %c3] : memref<8x8xf32, #tpu.memory_space<vmem>>, vector<8x1xf32>
    %c3_10 = arith.constant 3 : index
    %c0_11 = arith.constant 0 : index
    %18 = vector.load %arg2[%c3_10, %c0_11] : memref<9x128xf32, #tpu.memory_space<vmem>>, vector<1x128xf32>
    %19 = vector.broadcast %17 : vector<8x1xf32> to vector<8x128xf32>
    %20 = vector.broadcast %18 : vector<1x128xf32> to vector<8x128xf32>
    %21 = arith.mulf %19, %20 : vector<8x128xf32>
    %22 = arith.addf %16, %21 : vector<8x128xf32>
    %c0_12 = arith.constant 0 : index
    %c4 = arith.constant 4 : index
    %23 = vector.load %arg1[%c0_12, %c4] : memref<8x8xf32, #tpu.memory_space<vmem>>, vector<8x1xf32>
    %c4_13 = arith.constant 4 : index
    %c0_14 = arith.constant 0 : index
    %24 = vector.load %arg2[%c4_13, %c0_14] : memref<9x128xf32, #tpu.memory_space<vmem>>, vector<1x128xf32>
    %25 = vector.broadcast %23 : vector<8x1xf32> to vector<8x128xf32>
    %26 = vector.broadcast %24 : vector<1x128xf32> to vector<8x128xf32>
    %27 = arith.mulf %25, %26 : vector<8x128xf32>
    %28 = arith.addf %22, %27 : vector<8x128xf32>
    %c0_15 = arith.constant 0 : index
    %c5 = arith.constant 5 : index
    %29 = vector.load %arg1[%c0_15, %c5] : memref<8x8xf32, #tpu.memory_space<vmem>>, vector<8x1xf32>
    %c5_16 = arith.constant 5 : index
    %c0_17 = arith.constant 0 : index
    %30 = vector.load %arg2[%c5_16, %c0_17] : memref<9x128xf32, #tpu.memory_space<vmem>>, vector<1x128xf32>
    %31 = vector.broadcast %29 : vector<8x1xf32> to vector<8x128xf32>
    %32 = vector.broadcast %30 : vector<1x128xf32> to vector<8x128xf32>
    %33 = arith.mulf %31, %32 : vector<8x128xf32>
    %34 = arith.addf %28, %33 : vector<8x128xf32>
    %c0_18 = arith.constant 0 : index
    %c6 = arith.constant 6 : index
    %35 = vector.load %arg1[%c0_18, %c6] : memref<8x8xf32, #tpu.memory_space<vmem>>, vector<8x1xf32>
    %c6_19 = arith.constant 6 : index
    %c0_20 = arith.constant 0 : index
    %36 = vector.load %arg2[%c6_19, %c0_20] : memref<9x128xf32, #tpu.memory_space<vmem>>, vector<1x128xf32>
    %37 = vector.broadcast %35 : vector<8x1xf32> to vector<8x128xf32>
    %38 = vector.broadcast %36 : vector<1x128xf32> to vector<8x128xf32>
    %39 = arith.mulf %37, %38 : vector<8x128xf32>
    %40 = arith.addf %34, %39 : vector<8x128xf32>
    %c0_21 = arith.constant 0 : index
    %c7 = arith.constant 7 : index
    %41 = vector.load %arg1[%c0_21, %c7] : memref<8x8xf32, #tpu.memory_space<vmem>>, vector<8x1xf32>
    %c7_22 = arith.constant 7 : index
    %c0_23 = arith.constant 0 : index
    %42 = vector.load %arg2[%c7_22, %c0_23] : memref<9x128xf32, #tpu.memory_space<vmem>>, vector<1x128xf32>
    %43 = vector.broadcast %41 : vector<8x1xf32> to vector<8x128xf32>
    %44 = vector.broadcast %42 : vector<1x128xf32> to vector<8x128xf32>
    %45 = arith.mulf %43, %44 : vector<8x128xf32>
    %46 = arith.addf %40, %45 : vector<8x128xf32>
    %47 = math.sin %46 : vector<8x128xf32>
    %48 = math.cos %46 : vector<8x128xf32>
    %c8 = arith.constant 8 : index
    %c0_24 = arith.constant 0 : index
    %49 = vector.load %arg2[%c8, %c0_24] : memref<9x128xf32, #tpu.memory_space<vmem>>, vector<1x128xf32>
    %cst = arith.constant 5.000000e-01 : f32
    %50 = vector.broadcast %cst : f32 to vector<1x128xf32>
    %51 = arith.cmpf ogt, %49, %50 : vector<1x128xf32>
    %52 = vector.shape_cast %51 : vector<1x128xi1> to vector<1x128xi1>
    %53 = vector.broadcast %52 : vector<1x128xi1> to vector<8x128xi1>
    %54 = arith.select %53, %48, %47 : vector<8x128xi1>, vector<8x128xf32>
    %c0_25 = arith.constant 0 : index
    %c0_26 = arith.constant 0 : index
    %55 = vector.load %arg3[%c0_25, %c0_26] : memref<8x128xf32, #tpu.memory_space<vmem>>, vector<8x128xf32>
    tpu.vector_store %arg3[%c0_25, %c0_26], %54 {strides = array<i32>} : memref<8x128xf32, #tpu.memory_space<vmem>>, vector<8x128xf32>,
    return
  }
  func.func @transform_0(%arg0: i32) -> (i32, i32) {
    %c0_i32 = arith.constant 0 : i32
    %c0_i32_0 = arith.constant 0 : i32
    return %arg0, %c0_i32 : i32, i32
  }
  func.func @transform_1(%arg0: i32) -> (i32, i32) {
    %c0_i32 = arith.constant 0 : i32
    %c0_i32_0 = arith.constant 0 : i32
    %c0_i32_1 = arith.constant 0 : i32
    return %c0_i32, %c0_i32_0 : i32, i32
  }
  func.func @transform_2(%arg0: i32) -> (i32, i32) {
    %c0_i32 = arith.constant 0 : i32
    %c0_i32_0 = arith.constant 0 : i32
    return %arg0, %c0_i32 : i32, i32
  }
}

</mosaic_0001>

<bundles_post_ra>
// kernel: tpu_custom_call.1
= control target key start
LH: loop header
LB: loop body
LE: loop exit
PB: predicated region body
PF: predicated region fallthrough
CT: control target
= control target key end

     0   :  { %7 = vsyncpa [#allocation3], 0  ;;  %s585_s0 = inlined_call_operand.hbm [shape: f32[8,8], index: 0, kind: input, shape index: {}]   ;;  %s586_s1 = inlined_call_operand.hbm [shape: f32[9,128], index: 1, kind: input, shape index: {}]   ;;  %s587_s2 = inlined_call_operand.hbm [shape: f32[8,128], index: 2, kind: output, shape index: {}]  }
   0x1   :  { %8 = vsyncpa [#allocation6], 0 }
   0x2   :  { %9 = vsyncpa [#allocation4], 0  ;;  %s484_s9 = smov [#allocation2]   ;;  %s485_s11 = smov [#allocation5]  }
   0x3   :  { %s16_s10 = sshll.u32 %s484_s9, 4  ;;  %s25_s12 = sshll.u32 %s485_s11, 4  ;;  %s17_s10 = int_to_ptr.vmem [resolvable:$true] %s16_s10  ;;  %s518_s12 = int_to_ptr.vmem [resolvable:$true] %s25_s12 }
   0x4   :  { %s412_s15 = scalar_lea.hbm %s585_s0, 128 }
   0x5   :  { %p413_p0 = scmp.ne.s32.totalorder %s585_s0, %s412_s15  ;;  %p416_p1 = scmp.lt.u32.totalorder %s412_s15, %s585_s0 }
   0x7   :  { %p418_p2 = pnand %p416_p1, %p413_p0 }
   0x9   :  { %421 = shalt.err (!%p418_p2)
}
   0xa   :  { %s422_s20 = scalar_lea.vmem %s17_s10, 128  ;;  %p427_p4 = scmp.lt.s32.totalorder %s17_s10, %s17_s10 }
   0xb   :  { %p423_p3 = scmp.ne.s32.totalorder %s17_s10, %s422_s20  ;;  %p428_p5 = scmp.lt.s32.totalorder %s422_s20, %s422_s20 }
   0xd   :  { %p429_p6 = por %p428_p5, %p427_p4 }
   0xf   :  { %p430_p7 = pnand %p429_p6, %p423_p3 }
  0x11   :  { %433 = shalt.err (!%p430_p7)
}
  0x12   :  { %19 = dma.hbm_to_vmem [thread:$0]  %s585_s0, 128, %s17_s10, [#allocation3]  }
  0x13   :  { %s434_s25 = scalar_lea.hbm %s586_s1, 256 }
  0x14   :  { %p435_p8 = scmp.ne.s32.totalorder %s586_s1, %s434_s25  ;;  %p438_p9 = scmp.lt.u32.totalorder %s434_s25, %s586_s1 }
  0x16   :  { %p440_p10 = pnand %p438_p9, %p435_p8 }
  0x18   :  { %443 = shalt.err (!%p440_p10)
}
  0x19   :  { %s444_s30 = scalar_lea.vmem %s518_s12, 256  ;;  %p449_p12 = scmp.lt.s32.totalorder %s518_s12, %s518_s12 }
  0x1a   :  { %p445_p11 = scmp.ne.s32.totalorder %s518_s12, %s444_s30  ;;  %p450_p13 = scmp.lt.s32.totalorder %s444_s30, %s444_s30 }
  0x1c   :  { %p451_p0 = por %p450_p13, %p449_p12 }
  0x1e   :  { %p452_p1 = pnand %p451_p0, %p445_p11 }
  0x20   :  { %455 = shalt.err (!%p452_p1)
}
  0x21   :  { %s486_s0 = smov 128   ;;  %s487_s3 = smov 8  }
  0x22   :  { %31 = dma.hbm_to_vmem [thread:$0]  %s586_s1, 256, %s518_s12, [#allocation6], %s486_s0, %s486_s0, %s487_s3  }
  0x23   :  { %478 = dma.done.wait [#allocation3], 128  }
  0x24   :  { %479 = vsyncadd [#allocation3], 4294967168 }
  0x25   :  { %480 = dma.done.wait [#allocation6], 256  }
  0x26   :  { %481 = vsyncadd [#allocation6], 4294967040  ;;  %v488_v0 = vmov 2   ;;  %v489_v1 = vmov 0   ;;  %v38_v2 = vld [vmem:[#allocation2] sm:$0xff]  ;;  %v490_v3 = vmov 3  }
  0x27   :  { %401 = vset.pattern.permute.xlu1 %v488_v0  ;;  %399 = vset.pattern.permute.xlu0 %v489_v1  ;;  %v491_v4 = vmov 1   ;;  %v492_v5 = vmov 4   ;;  %v493_v6 = vmov 5   ;;  %v494_v7 = vmov 6   ;;  %v360_v11 = vld [vmem:[#allocation5] ss:$0 sm:$0xff] }
  0x28   :  { %63 = vperm.xlu1 %401, %v38_v2   ;;  %42 = vperm.xlu0 %399, %v38_v2   ;;  %v495_v8 = vmov 7   ;;  %v361_v12 = vld [vmem:[#allocation5 + $0x1] ss:$0 sm:$0xff]  ;;  %v362_v13 = vld [vmem:[#allocation5 + $0x2] ss:$0 sm:$0xff]  ;;  %s502_s1 = smov [#allocation7]  }
  0x29   :  { %v363_v18 = vld [vmem:[#allocation5 + $0x3] ss:$0 sm:$0xff]  ;;  %v364_v21 = vld [vmem:[#allocation5 + $0x4] ss:$0 sm:$0xff]  ;;  %v365_v25 = vld [vmem:[#allocation5 + $0x5] ss:$0 sm:$0xff] }
  0x2a   :  { %v366_v31 = vld [vmem:[#allocation5 + $0x6] ss:$0 sm:$0xff]  ;;  %v367_v35 = vld [vmem:[#allocation5 + $0x7] ss:$0 sm:$0xff]  ;;  %v496_v50 = vmov 683565275  }
  0x2b   :  { %v497_v52 = vmov 2475754826   ;;  %v498_v55 = vmov 2131351028   ;;  %v499_v58 = vmov 2102212464  }
  0x2c   :  { %402 = vset.pattern.permute.xlu1 %v490_v3  ;;  %400 = vset.pattern.permute.xlu0 %v491_v4  ;;  %v500_v61 = vmov 920167782   ;;  %v501_v0 = vmov 1326507024   ;;  %s350_s6 = sshll.u32 %s502_s1, 4  ;;  %s351_s6 = int_to_ptr.vmem [resolvable:$true] %s350_s6 }
  0x2d   :  { %74 = vperm.xlu1 %402, %v38_v2   ;;  %52 = vperm.xlu0 %400, %v38_v2   ;;  %s456_s7 = scalar_lea.vmem %s351_s6, 128  ;;  %p461_p3 = scmp.lt.s32.totalorder %s351_s6, %s351_s6 }
  0x2e   :  { %p457_p2 = scmp.ne.s32.totalorder %s351_s6, %s456_s7  ;;  %p462_p4 = scmp.lt.s32.totalorder %s456_s7, %s456_s7 }
  0x30   :  { %p463_p5 = por %p462_p4, %p461_p3 }
  0x31   :  { %403 = vset.pattern.permute.xlu1 %v492_v5  ;;  %404 = vset.pattern.permute.xlu0 %v493_v6 }
  0x32   :  { %85 = vperm.xlu1 %403, %v38_v2   ;;  %96 = vperm.xlu0 %404, %v38_v2   ;;  %p464_p6 = pnand %p463_p5, %p457_p2 }
  0x36   :  { %405 = vset.pattern.permute.xlu1 %v494_v7  ;;  %407 = vset.pattern.permute.xlu0 %v495_v8 }
  0x37   :  { %107 = vperm.xlu1 %405, %v38_v2  }
  0x3b   :  { %406 = vset.pattern.permute.xlu1 %v495_v8 }
  0x3c   :  { %118 = vperm.xlu1 %406, %v38_v2  }
  0xa7   :  { %v64_v9 = vpop.permute.xlu1 %63  ;;  %v43_v10 = vpop.permute.xlu0 %42 }
  0xa8   :  { %v49_v16 = vmul.f32 %v360_v11, %v43_v10  ;;  %v70_v19 = vmul.f32 %v362_v13, %v64_v9 }
  0xac   :  { %v75_v14 = vpop.permute.xlu1 %74  ;;  %v53_v15 = vpop.permute.xlu0 %52 }
  0xad   :  { %v59_v17 = vmul.f32 %v361_v12, %v53_v15  ;;  %v81_v22 = vmul.f32 %v363_v18, %v75_v14 }
  0xaf   :  { %v60_v20 = vadd.f32 %v59_v17, %v49_v16 }
  0xb1   :  { %v71_v23 = vadd.f32 %v70_v19, %v60_v20  ;;  %v86_v24 = vpop.permute.xlu1 %85  ;;  %v97_v26 = vpop.permute.xlu0 %96 }
  0xb2   :  { %v92_v27 = vmul.f32 %v364_v21, %v86_v24  ;;  %v103_v29 = vmul.f32 %v365_v25, %v97_v26 }
  0xb3   :  { %v82_v28 = vadd.f32 %v81_v22, %v71_v23 }
  0xb5   :  { %v93_v30 = vadd.f32 %v92_v27, %v82_v28 }
  0xb6   :  { %v108_v32 = vpop.permute.xlu1 %107 }
  0xb7   :  { %v104_v33 = vadd.f32 %v103_v29, %v93_v30  ;;  %v114_v34 = vmul.f32 %v366_v31, %v108_v32 }
  0xb9   :  { %v115_v37 = vadd.f32 %v114_v34, %v104_v33 }
  0xbb   :  { %v119_v36 = vpop.permute.xlu1 %118 }
  0xbc   :  { %v125_v38 = vmul.f32 %v367_v35, %v119_v36 }
  0xbe   :  { %v550_v39 = vadd.f32 %v125_v38, %v115_v37 }
  0xc0   :  { %v130_v40 = vand.u32 2139095040, %v550_v39  ;;  %v127_v44 = vand.u32 2147483647, %v550_v39  ;;  %vm129_vm7 = vcmp.lt.s32.totalorder %v550_v39, 0 }
  0xc2   :  { %v131_v41 = vshrl.u32 %v130_v40, 23  ;;  %v134_v47 = vand.u32 8388607, %v127_v44  ;;  %vm128_vm8 = vcmp.le.f32.partialorder %v127_v44, 0.7853982 }
  0xc4   :  { %v368_v42 = vadd.s32 4294967169, %v131_v41  ;;  %v135_v3 = vor.u32 8388608, %v134_v47 }
  0xc6   :  { %v137_v43 = vadd.s32 1, %v368_v42  ;;  %v175_v17 = vshll.u32 %v135_v3, 8 }
  0xc8   :  { %vm138_vm0 = vcmp.gt.s32.totalorder %v137_v43, 0 }
  0xc9   :  { %v139_v45 = vsel %vm138_vm0, %v137_v43, 0 }
  0xca   :  { %v141_v46 = vand.u32 31, %v139_v45  ;;  %v140_v49 = vshrl.u32 %v139_v45, 5 }
  0xcc   :  { %v142_v48 = vsub.s32 32, %v141_v46  ;;  %v144_v51 = vshll.u32 %v496_v50, %v141_v46  ;;  %v147_v53 = vshll.u32 %v497_v52, %v141_v46  ;;  %v150_v57 = vshll.u32 %v498_v55, %v141_v46 }
  0xcd   :  { %v153_v60 = vshll.u32 %v499_v58, %v141_v46  ;;  %v156_v63 = vshll.u32 %v500_v61, %v141_v46  ;;  %vm159_vm1 = vcmp.lt.s32.totalorder %v140_v49, 1  ;;  %vm162_vm2 = vcmp.lt.s32.totalorder %v140_v49, 4 }
  0xce   :  { %v145_v54 = vshrl.u32 %v497_v52, %v142_v48  ;;  %v148_v56 = vshrl.u32 %v498_v55, %v142_v48  ;;  %v151_v59 = vshrl.u32 %v499_v58, %v142_v48  ;;  %v154_v62 = vshrl.u32 %v500_v61, %v142_v48 }
  0xcf   :  { %v157_v2 = vshrl.u32 %v501_v0, %v142_v48  ;;  %v143_v12 = vshrl.u32 %v496_v50, %v142_v48  ;;  %vm161_vm3 = vcmp.lt.s32.totalorder %v140_v49, 3  ;;  %vm160_vm4 = vcmp.lt.s32.totalorder %v140_v49, 2 }
  0xd0   :  { %v146_v4 = vor.u32 %v145_v54, %v144_v51  ;;  %v149_v5 = vor.u32 %v148_v56, %v147_v53  ;;  %v152_v6 = vor.u32 %v151_v59, %v150_v57  ;;  %v155_v7 = vor.u32 %v154_v62, %v153_v60  ;;  %v334_v59 = vld [vmem:[#allocation5 + $0x8] sm:$0x1] }
  0xd1   :  { %v158_v8 = vor.u32 %v157_v2, %v156_v63  ;;  %v337_v55 = vlaneseq  ;;  %vm335_vm9 = vcmp.gt.f32.partialorder %v334_v59, 0.5 }
  0xd2   :  { %v164_v9 = vsel %vm162_vm2, %v152_v6, 2102212464  ;;  %v167_v10 = vsel %vm159_vm1, %v146_v4, %v149_v5  ;;  %v171_v11 = vsel %vm159_vm1, %v149_v5, %v152_v6  ;;  %v168_v13 = vsel %vm162_vm2, %v155_v7, 920167782 }
  0xd3   :  { %v172_v14 = vsel %vm162_vm2, %v158_v8, 1326507024  ;;  %v169_v15 = vsel %vm161_vm3, %v152_v6, %v168_v13  ;;  %v163_v18 = vsel %vm159_vm1, %v143_v12, %v146_v4  ;;  %v165_v19 = vsel %vm161_vm3, %v149_v5, %v164_v9 }
  0xd4   :  { %v173_v16 = vsel %vm161_vm3, %v155_v7, %v172_v14  ;;  %v170_v20 = vsel %vm160_vm4, %v167_v10, %v169_v15  ;;  %v166_v26 = vsel %vm160_vm4, %v163_v18, %v165_v19  ;;  %v338_v61 = vshrl.u32 %v337_v55, 7 }
  0xd5   :  { %v174_v21 = vsel %vm160_vm4, %v171_v11, %v173_v16  ;;  %v559_v24 = vmul.u32.u64.low %v175_v17, %v170_v20  ;;  %v560_v25 = vmul.u32.u64.high %v175_v17, %v170_v20, %v559_v24  ;;  %v182_v28 = vmul.u32 %v175_v17, %v166_v26 }
  0xd6   :  { %v556_v22 = vmul.u32.u64.low %v175_v17, %v174_v21  ;;  %v557_v23 = vmul.u32.u64.high %v175_v17, %v174_v21, %v556_v22  ;;  %v339_v63 = vsub.s32 0, %v338_v61  ;;  %v336_v2 = vsel %vm335_vm9, 1, %v489_v1 }
  0xd7   :  { %v185_v27 = vadd.s32 1, %v560_v25  ;;  %vm219_vm1 = vweird.f32 %v550_v39 }
  0xd8   :  { %vm184_vm5 = vc.u32 %v557_v23, %v559_v24  ;;  %v183_v41 = vadd.s32 %v559_v24, %v557_v23  ;;  %v340_v3 = vrot.slane %v336_v2, %v339_v63 }
  0xd9   :  { %v186_v29 = vsel %vm184_vm5, %v185_v27, %v560_v25 }
  0xda   :  { %v187_v30 = vadd.s32 %v186_v29, %v182_v28  ;;  %vm341_vm10 = vcmp.eq.s32.totalorder %v340_v3, 1 }
  0xdc   :  { %v188_v31 = vadd.s32 536870912, %v187_v30 }
  0xde   :  { %v189_v32 = vshrl.u32 %v188_v31, 30 }
  0xe0   :  { %v190_v33 = vshll.u32 %v189_v32, 30  ;;  %v213_v54 = vsub.s32 4, %v189_v32 }
  0xe2   :  { %v191_v34 = vsub.s32 %v187_v30, %v190_v33  ;;  %v214_v58 = vsel %vm129_vm7, %v213_v54, %v189_v32 }
  0xe3   :  { %v216_v62 = vsel %vm128_vm8, 0, %v214_v58 }
  0xe4   :  { %v193_v35 = vsub.s32 0, %v191_v34  ;;  %v220_v0 = vadd.s32 3, %v216_v62  ;;  %v324_v5 = vand.u32 3, %v216_v62 }
  0xe6   :  { %v369_v36 = vmin.u32 %v193_v35, %v191_v34  ;;  %v221_v4 = vand.u32 3, %v220_v0  ;;  %vm329_vm12 = vcmp.eq.s32.totalorder %v324_v5, 2  ;;  %vm326_vm14 = vcmp.eq.s32.totalorder %v324_v5, 0 }
  0xe7   :  { %vm325_vm0 = vcmp.lt.s32.totalorder %v324_v5, 2 }
  0xe8   :  { %v195_v37 = vclz %v369_v36  ;;  %vm226_vm11 = vcmp.eq.s32.totalorder %v221_v4, 2  ;;  %vm223_vm13 = vcmp.eq.s32.totalorder %v221_v4, 0  ;;  %vm222_vm15 = vcmp.lt.s32.totalorder %v221_v4, 2 }
  0xea   :  { %v370_v38 = vadd.s32 4294967294, %v195_v37 }
  0xec   :  { %vm371_vm6 = vcmp.lt.s32.totalorder %v370_v38, 0 }
  0xed   :  { %v198_v40 = vsel %vm371_vm6, 0, %v370_v38 }
  0xee   :  { %v199_v42 = vsub.s32 32, %v198_v40  ;;  %v203_v43 = vsub.s32 4294967266, %v198_v40  ;;  %v200_v45 = vshll.u32 %v191_v34, %v198_v40 }
  0xf0   :  { %v201_v46 = vshrl.u32 %v183_v41, %v199_v42  ;;  %v204_v47 = vadd.s32 127, %v203_v43 }
  0xf2   :  { %v202_v48 = vor.u32 %v201_v46, %v200_v45  ;;  %v205_v49 = vshll.u32 %v204_v47, 23 }
  0xf4   :  { %v206_v50 = vor.u32 4788187, %v205_v49  ;;  %v209_v52 = vcvt.s32.f32 %v202_v48 }
  0xf6   :  { %v207_v51 = vand.u32 2147483647, %v206_v50 }
  0xf8   :  { %v210_v53 = vmul.f32 %v209_v52, %v207_v51 }
  0xfa   :  { %v211_v56 = vxor.u32 2147483648, %v210_v53 }
  0xfc   :  { %v212_v57 = vsel %vm129_vm7, %v211_v56, %v210_v53 }
  0xfd   :  { %v215_v60 = vsel %vm128_vm8, %v550_v39, %v212_v57 }
  0xfe   :  { %408 = vcosq.f32 %v215_v60 }
  0xff   :  { %410 = vsinq.f32 %v215_v60 }
 0x108   :  { %v409_v6 = vpop.eup %408 }
 0x109   :  { %v411_v7 = vpop.eup %410  ;;  %v227_v8 = vxor.u32 2147483648, %v409_v6 }
 0x10a   :  { %v224_v44 = vxor.u32 2147483648, %v411_v7 }
 0x10b   :  { %v228_v9 = vsel %vm226_vm11, %v227_v8, %v411_v7  ;;  %v331_v10 = vsel %vm329_vm12, %v227_v8, %v411_v7 }
 0x10c   :  { %v225_v11 = vsel %vm223_vm13, %v409_v6, %v224_v44  ;;  %v328_v1 = vsel %vm326_vm14, %v409_v6, %v224_v44 }
 0x10d   :  { %v229_v12 = vsel %vm222_vm15, %v225_v11, %v228_v9  ;;  %v332_v13 = vsel %vm325_vm0, %v328_v1, %v331_v10 }
 0x10e   :  { %v230_v14 = vsel %vm219_vm1, nan, %v229_v12  ;;  %v333_v15 = vsel %vm219_vm1, nan, %v332_v13 }
 0x10f   :  { %v342_v16 = vsel %vm341_vm10, %v333_v15, %v230_v14 }
 0x110   :  { %343 = vst [vmem:[#allocation7] sm:$0xff] %v342_v16 }
 0x111   :  { %467 = shalt.err (!%p464_p6)
}
 0x112   :  { %s468_s10 = scalar_lea.hbm %s587_s2, 128 }
 0x113   :  { %p469_p7 = scmp.ne.s32.totalorder %s587_s2, %s468_s10  ;;  %p472_p8 = scmp.lt.u32.totalorder %s468_s10, %s587_s2 }
 0x115   :  { %p474_p9 = pnand %p472_p8, %p469_p7 }
 0x117   :  { %477 = shalt.err (!%p474_p9)
}
 0x118   :  { %353 = dma.vmem_to_hbm [thread:$0]  %s351_s6, 128, %s587_s2, [#allocation4]  }
 0x119   :  { %482 = dma.done.wait [#allocation4], 128  }
 0x11a   :  { %483 = vsyncadd [#allocation4], 4294967168 }
 0x11b   :  { %357 = vsyncpa [#allocation3], 1 }
 0x11c   :  { %358 = vsyncpa [#allocation6], 1 }
 0x11d   :  { %359 = vsyncpa [#allocation4], 1 }

</bundles_post_ra>
